<compile_context>
chip_gen: v7x
topology: tpu7x:2x2x1
jax: 0.10.0
libtpu: 0.0.40
codegen_flags: <defaults>
</compile_context>

<pallas_src>
import functools

import jax
import jax.numpy as jnp
from jax import lax
from jax.experimental import pallas as pl
from jax.experimental.pallas import tpu as pltpu

# Model hyperparameters (match TCN.__init__ defaults)
C_IN = 1        # initial_channel
C_HID = 8       # hidden_channel
C_OUT = 64      # out_channel
K1, S1 = 19, 9  # conv1 kernel size / stride
K2 = 10         # conv2 kernel size (stride 1)


def _round_up(n, m):
    return ((n + m - 1) // m) * m


def tcn_kernel(x_ref, w1_ref, b1_ref, w2_ref, b2_ref, out_ref):
    """Fused conv1 + ReLU + conv2 + ReLU + negate for one batch tile.

    x_ref  : (Bt, L)            raw signal tile (lane-dense, no im2col)
    w1_ref : (L, T1*C_HID)      conv1 as block-diagonal dense weight
    b1_ref : (1, T1*C_HID)      conv1 bias tiled over the T1 positions (f32)
    w2_ref : (T1*C_HID, C_OUT)  conv2 flattened (length dim collapses to 1)
    b2_ref : (1, C_OUT)         conv2 bias (f32)
    out_ref: (Bt, C_OUT)
    """
    # Conv1: one MXU matmul; f32 accumulation.
    h = jnp.dot(x_ref[...], w1_ref[...], preferred_element_type=jnp.float32)
    h = jnp.maximum(h + b1_ref[...], 0.0)              # bias + ReLU in f32 (VPU)
    # Conv2: one MXU matmul over the flattened (position, channel) axis.
    y = jnp.dot(h.astype(w2_ref.dtype), w2_ref[...],
                preferred_element_type=jnp.float32)
    y = jnp.maximum(y + b2_ref[...], 0.0)              # bias + ReLU in f32
    out_ref[...] = (-y).astype(out_ref.dtype)          # negate


@functools.partial(jax.jit, static_argnames=("compute_dtype", "b_tile"))
def tcn_forward(x, w1, b1, w2, b2, compute_dtype=jnp.bfloat16, b_tile=512):
    """x: (B, L) f32; w1: (C_HID, C_IN, K1); b1: (C_HID,);
    w2: (C_OUT, C_HID, K2); b2: (C_OUT,). Returns (B, C_OUT) f32."""
    B, L = x.shape
    T1 = (L - K1) // S1 + 1
    assert T1 == K2, f"input length {L} must make conv2 output length 1"
    H = T1 * C_HID                                     # 80

    # ---- weight re-layout (wrapper glue, tiny arrays) -----------------------
    # Block-diagonal conv1 weight:  w1_blk[S1*t + k, C_HID*t + c] = w1[c, 0, k]
    w1k = jnp.transpose(w1[:, 0, :], (1, 0))           # (K1, C_HID) [k, c]
    t_ar = jnp.arange(T1)
    rows = S1 * t_ar[:, None, None] + jnp.arange(K1)[None, :, None]
    cols = C_HID * t_ar[:, None, None] + jnp.arange(C_HID)[None, None, :]
    rows = jnp.broadcast_to(rows, (T1, K1, C_HID)).ravel()
    cols = jnp.broadcast_to(cols, (T1, K1, C_HID)).ravel()
    vals = jnp.broadcast_to(w1k[None, :, :], (T1, K1, C_HID)).ravel()
    w1_blk = jnp.zeros((L, H), jnp.float32).at[rows, cols].set(vals)

    # Conv2 flattened: w2_flat[t*C_HID + c, o] = w2[o, c, t]
    w2_flat = jnp.transpose(w2, (2, 1, 0)).reshape(H, C_OUT)
    b1_row = jnp.tile(b1, T1).reshape(1, H).astype(jnp.float32)
    b2_row = b2.reshape(1, C_OUT).astype(jnp.float32)

    # ---- batch tiling -------------------------------------------------------
    B_TILE = min(b_tile, _round_up(B, 16))
    B_pad = _round_up(B, B_TILE)
    if B_pad != B:
        x = jnp.pad(x, ((0, B_pad - B), (0, 0)))
    grid = (B_pad // B_TILE,)

    x_c = x.astype(compute_dtype)
    w1_c = w1_blk.astype(compute_dtype)
    w2_c = w2_flat.astype(compute_dtype)

    out = pl.pallas_call(
        tcn_kernel,
        out_shape=jax.ShapeDtypeStruct((B_pad, C_OUT), jnp.float32),
        grid=grid,
        in_specs=[
            pl.BlockSpec((B_TILE, L), lambda i: (i, 0)),
            pl.BlockSpec((L, H), lambda i: (0, 0)),
            pl.BlockSpec((1, H), lambda i: (0, 0)),
            pl.BlockSpec((H, C_OUT), lambda i: (0, 0)),
            pl.BlockSpec((1, C_OUT), lambda i: (0, 0)),
        ],
        out_specs=pl.BlockSpec((B_TILE, C_OUT), lambda i: (i, 0)),
        compiler_params=pltpu.CompilerParams(
            dimension_semantics=("parallel",)),   # shards batch across TCs on v7x
    )(x_c, w1_c, b1_row, w2_c, b2_row)

    return out[:B]


def tcn_reference(x, w1, b1, w2, b2):
    """Pure-JAX reference mirroring the PyTorch forward (NCL convs)."""
    h = x[:, None, :]                                  # unsqueeze(dim=1) -> (B,1,L)
    h = lax.conv_general_dilated(
        h, w1, window_strides=(S1,), padding="VALID",
        dimension_numbers=("NCH", "OIH", "NCH")) + b1[None, :, None]
    h = jnp.maximum(h, 0.0)
    h = lax.conv_general_dilated(
        h, w2, window_strides=(1,), padding="VALID",
        dimension_numbers=("NCH", "OIH", "NCH")) + b2[None, :, None]
    h = jnp.maximum(h, 0.0)
    return -h[:, :, 0]                                 # squeeze(dim=-1), negate


if __name__ == "__main__":
    B, L = 2, 100   # L=100 -> conv1 len 10 -> conv2 len 1 (valid squeeze)

    key = jax.random.PRNGKey(0)
    kx, k1, k2, k3, k4 = jax.random.split(key, 5)

    x = jax.random.normal(kx, (B, L), dtype=jnp.float32)
    # Deterministic synthetic parameters (shapes from nn.Conv1d in __init__).
    w1 = 0.1 * jax.random.normal(k1, (C_HID, C_IN, K1), dtype=jnp.float32)
    b1 = 0.1 * jax.random.normal(k2, (C_HID,), dtype=jnp.float32)
    w2 = 0.1 * jax.random.normal(k3, (C_OUT, C_HID, K2), dtype=jnp.float32)
    b2 = 0.1 * jax.random.normal(k4, (C_OUT,), dtype=jnp.float32)

    ref = jax.block_until_ready(tcn_reference(x, w1, b1, w2, b2))

    # Tight check with the f32 compute path.
    out_f32 = jax.block_until_ready(
        tcn_forward(x, w1, b1, w2, b2, compute_dtype=jnp.float32))
    assert out_f32.shape == (B, C_OUT), out_f32.shape
    assert jnp.allclose(out_f32, ref, atol=1e-4, rtol=1e-4), (
        f"f32 max abs err {jnp.max(jnp.abs(out_f32 - ref))}")

    # Default (bf16 MXU inputs, f32 accumulation) path: loose check.
    out_bf16 = jax.block_until_ready(tcn_forward(x, w1, b1, w2, b2))
    assert out_bf16.shape == (B, C_OUT), out_bf16.shape
    assert jnp.allclose(out_bf16, ref, atol=5e-2, rtol=5e-2), (
        f"bf16 max abs err {jnp.max(jnp.abs(out_bf16 - ref))}")

    print("KERNEL_OK")
</pallas_src>

<mosaic_0001>
module attributes {stable_mosaic.version = 11 : i64} {
  func.func @tcn_kernel(%arg0: i32, %arg1: memref<16x100xf32, #tpu.memory_space<vmem>>, %arg2: memref<100x80xf32, #tpu.memory_space<vmem>>, %arg3: memref<1x80xf32, #tpu.memory_space<vmem>>, %arg4: memref<80x64xf32, #tpu.memory_space<vmem>>, %arg5: memref<1x64xf32, #tpu.memory_space<vmem>>, %arg6: memref<16x64xf32, #tpu.memory_space<vmem>>) attributes {dimension_semantics = [#tpu.dimension_semantics<parallel>], iteration_bounds = array<i64: 1>, scalar_prefetch = 0 : i64, scratch_operands = 0 : i64, tpu.core_type = #tpu.core_type<tc>, window_params = [{transform_indices = @transform_0, window_bounds = array<i64: 16, 100>}, {pipeline_mode = #tpu.pipeline_mode<synchronous>, transform_indices = @transform_1, window_bounds = array<i64: 100, 80>}, {pipeline_mode = #tpu.pipeline_mode<synchronous>, transform_indices = @transform_2, window_bounds = array<i64: 1, 80>}, {pipeline_mode = #tpu.pipeline_mode<synchronous>, transform_indices = @transform_3, window_bounds = array<i64: 80, 64>}, {pipeline_mode = #tpu.pipeline_mode<synchronous>, transform_indices = @transform_4, window_bounds = array<i64: 1, 64>}, {transform_indices = @transform_5, window_bounds = array<i64: 16, 64>}]} {
    %c0 = arith.constant 0 : index
    %c0_0 = arith.constant 0 : index
    %0 = vector.load %arg1[%c0, %c0_0] : memref<16x100xf32, #tpu.memory_space<vmem>>, vector<16x100xf32>
    %c0_1 = arith.constant 0 : index
    %c0_2 = arith.constant 0 : index
    %1 = vector.load %arg2[%c0_1, %c0_2] : memref<100x80xf32, #tpu.memory_space<vmem>>, vector<100x80xf32>
    %cst = arith.constant dense<0.000000e+00> : vector<16x80xf32>
    %2 = tpu.matmul %0, %1, %cst {dimension_numbers = #tpu.dot_dimension_numbers<[1], [0], [0], [1], [0, 0, 1, 1], [], []>} : vector<16x100xf32>, vector<100x80xf32>, vector<16x80xf32> -> vector<16x80xf32>
    %c0_3 = arith.constant 0 : index
    %c0_4 = arith.constant 0 : index
    %3 = vector.load %arg3[%c0_3, %c0_4] : memref<1x80xf32, #tpu.memory_space<vmem>>, vector<1x80xf32>
    %4 = vector.broadcast %3 : vector<1x80xf32> to vector<16x80xf32>
    %5 = arith.addf %2, %4 : vector<16x80xf32>
    %cst_5 = arith.constant 0.000000e+00 : f32
    %6 = vector.broadcast %cst_5 : f32 to vector<16x80xf32>
    %7 = arith.maximumf %5, %6 : vector<16x80xf32>
    %c0_6 = arith.constant 0 : index
    %c0_7 = arith.constant 0 : index
    %8 = vector.load %arg4[%c0_6, %c0_7] : memref<80x64xf32, #tpu.memory_space<vmem>>, vector<80x64xf32>
    %cst_8 = arith.constant dense<0.000000e+00> : vector<16x64xf32>
    %9 = tpu.matmul %7, %8, %cst_8 {dimension_numbers = #tpu.dot_dimension_numbers<[1], [0], [0], [1], [0, 0, 1, 1], [], []>} : vector<16x80xf32>, vector<80x64xf32>, vector<16x64xf32> -> vector<16x64xf32>
    %c0_9 = arith.constant 0 : index
    %c0_10 = arith.constant 0 : index
    %10 = vector.load %arg5[%c0_9, %c0_10] : memref<1x64xf32, #tpu.memory_space<vmem>>, vector<1x64xf32>
    %11 = vector.broadcast %10 : vector<1x64xf32> to vector<16x64xf32>
    %12 = arith.addf %9, %11 : vector<16x64xf32>
    %cst_11 = arith.constant 0.000000e+00 : f32
    %13 = vector.broadcast %cst_11 : f32 to vector<16x64xf32>
    %14 = arith.maximumf %12, %13 : vector<16x64xf32>
    %cst_12 = arith.constant 0.000000e+00 : f32
    %15 = vector.broadcast %cst_12 : f32 to vector<16x64xf32>
    %16 = arith.subf %15, %14 : vector<16x64xf32>
    %c0_13 = arith.constant 0 : index
    %c0_14 = arith.constant 0 : index
    %17 = vector.load %arg6[%c0_13, %c0_14] : memref<16x64xf32, #tpu.memory_space<vmem>>, vector<16x64xf32>
    tpu.vector_store %arg6[%c0_13, %c0_14], %16 {strides = array<i32>} : memref<16x64xf32, #tpu.memory_space<vmem>>, vector<16x64xf32>,
    return
  }
  func.func @transform_0(%arg0: i32) -> (i32, i32) {
    %c0_i32 = arith.constant 0 : i32
    %c0_i32_0 = arith.constant 0 : i32
    return %arg0, %c0_i32 : i32, i32
  }
  func.func @transform_1(%arg0: i32) -> (i32, i32) {
    %c0_i32 = arith.constant 0 : i32
    %c0_i32_0 = arith.constant 0 : i32
    %c0_i32_1 = arith.constant 0 : i32
    return %c0_i32, %c0_i32_0 : i32, i32
  }
  func.func @transform_2(%arg0: i32) -> (i32, i32) {
    %c0_i32 = arith.constant 0 : i32
    %c0_i32_0 = arith.constant 0 : i32
    %c0_i32_1 = arith.constant 0 : i32
    return %c0_i32, %c0_i32_0 : i32, i32
  }
  func.func @transform_3(%arg0: i32) -> (i32, i32) {
    %c0_i32 = arith.constant 0 : i32
    %c0_i32_0 = arith.constant 0 : i32
    %c0_i32_1 = arith.constant 0 : i32
    return %c0_i32, %c0_i32_0 : i32, i32
  }
  func.func @transform_4(%arg0: i32) -> (i32, i32) {
    %c0_i32 = arith.constant 0 : i32
    %c0_i32_0 = arith.constant 0 : i32
    %c0_i32_1 = arith.constant 0 : i32
    return %c0_i32, %c0_i32_0 : i32, i32
  }
  func.func @transform_5(%arg0: i32) -> (i32, i32) {
    %c0_i32 = arith.constant 0 : i32
    %c0_i32_0 = arith.constant 0 : i32
    return %arg0, %c0_i32 : i32, i32
  }
}

</mosaic_0001>

<bundles_post_ra>
// kernel: tile.9
= control target key start
LH: loop header
LB: loop body
LE: loop exit
PB: predicated region body
PF: predicated region fallthrough
CT: control target
= control target key end

     0   :  { %s83_s10 = smov 72   ;;  %s84_s11 = smov 56   ;;  %vm3_vm0 = vcmask 64512   ;;  %vm9_vm1 = vcmask 654912   ;;  %vm15_vm2 = vcmask 589312   ;;  %vm21_vm3 = vcmask 523712   ;;  %s135_s0 = inlined_call_operand.vmem [shape: f32[10,8], index: 0, kind: input, shape index: {}]   ;;  %s136_s1 = inlined_call_operand.vmem [shape: f32[1,80], index: 1, kind: output, shape index: {}]  }
   0x1   :  { %v65_v0 = vld [vmem:[%s135_s0 + $0x9] sm:$0x1]   ;;  %v67_v1 = vld [vmem:[%s135_s0 + $0x7] sm:$0x1]   ;;  %v66_v2 = vld [vmem:[%s135_s0 + $0x8] sm:$0x1]  }
   0x2   :  { %7 = vrot.lane.b32.xlu0 %v65_v0, %s83_s10  ;;  %19 = vrot.lane.b32.xlu1 %v67_v1, %s84_s11  ;;  %v68_v3 = vld [vmem:[%s135_s0 + $0x6] sm:$0x1]   ;;  %v2_v4 = vld [vmem:[%s135_s0] sm:$0x1]   ;;  %s85_s18 = smov 64   ;;  %s86_s19 = smov 48  }
   0x3   :  { %v69_v5 = vld [vmem:[%s135_s0 + $0x5] sm:$0x1]   ;;  %v70_v6 = vld [vmem:[%s135_s0 + $0x4] sm:$0x1]   ;;  %4 = vst.msk [vmem:[#allocation0] sm:$0x1] %vm3_vm0, %v2_v4  }
   0x4   :  { %s87_s24 = smov 40   ;;  %s88_s25 = smov 32   ;;  %v71_v7 = vld [vmem:[%s135_s0 + $0x3] sm:$0x1]   ;;  %v72_v8 = vld [vmem:[%s135_s0 + $0x2] sm:$0x1]  }
   0x5   :  { %s89_s30 = smov 24   ;;  %s90_s2 = smov 16   ;;  %v73_v9 = vld [vmem:[%s135_s0 + $0x1] sm:$0x1]   ;;  %vm27_vm4 = vcmask 458112   ;;  %vm33_vm5 = vcmask 392512  }
   0x6   :  { %13 = vrot.lane.b32.xlu0 %v66_v2, %s85_s18  ;;  %25 = vrot.lane.b32.xlu1 %v68_v3, %s86_s19  ;;  %s91_s0 = smov 8   ;;  %vm39_vm6 = vcmask 326912   ;;  %vm45_vm7 = vcmask 261312   ;;  %vm51_vm8 = vcmask 195712   ;;  %vm57_vm9 = vcmask 130112  }
   0xa   :  { %31 = vrot.lane.b32.xlu0 %v69_v5, %s87_s24  ;;  %37 = vrot.lane.b32.xlu1 %v70_v6, %s88_s25 }
   0xe   :  { %43 = vrot.lane.b32.xlu0 %v71_v7, %s89_s30  ;;  %49 = vrot.lane.b32.xlu1 %v72_v8, %s90_s2 }
  0x12   :  { %55 = vrot.lane.b32.xlu0 %v73_v9, %s91_s0 }
  0x74   :  { %v8_v10 = vpop.permute.xlu0 %7   ;;  %v20_v11 = vpop.permute.xlu1 %19  }
  0x75   :  { %10 = vst.msk [vmem:[#allocation0] sm:$0x1] %vm9_vm1, %v8_v10  }
  0x78   :  { %v14_v12 = vpop.permute.xlu0 %13   ;;  %v26_v13 = vpop.permute.xlu1 %25  }
  0x79   :  { %16 = vst.msk [vmem:[#allocation0] sm:$0x1] %vm15_vm2, %v14_v12  }
  0x7a   :  { %22 = vst.msk [vmem:[#allocation0] sm:$0x1] %vm21_vm3, %v20_v11  }
  0x7b   :  { %28 = vst.msk [vmem:[#allocation0] sm:$0x1] %vm27_vm4, %v26_v13  }
  0x7c   :  { %v32_v14 = vpop.permute.xlu0 %31   ;;  %v38_v15 = vpop.permute.xlu1 %37  }
  0x7d   :  { %34 = vst.msk [vmem:[#allocation0] sm:$0x1] %vm33_vm5, %v32_v14  }
  0x7e   :  { %40 = vst.msk [vmem:[#allocation0] sm:$0x1] %vm39_vm6, %v38_v15  }
  0x80   :  { %v44_v16 = vpop.permute.xlu0 %43   ;;  %v50_v17 = vpop.permute.xlu1 %49  }
  0x81   :  { %46 = vst.msk [vmem:[#allocation0] sm:$0x1] %vm45_vm7, %v44_v16  }
  0x82   :  { %52 = vst.msk [vmem:[#allocation0] sm:$0x1] %vm51_vm8, %v50_v17  }
  0x84   :  { %v56_v18 = vpop.permute.xlu0 %55  }
  0x85   :  { %58 = vst.msk [vmem:[#allocation0] sm:$0x1] %vm57_vm9, %v56_v18  }
  0x8c   :  { %v62_v19 = vld [vmem:[#allocation0] sm:$0x1] }
  0x8d   :  { %64 = vst [vmem:[%s136_s1] sm:$0x1] %v62_v19 }

// kernel: tile.8
= control target key start
LH: loop header
LB: loop body
LE: loop exit
PB: predicated region body
PF: predicated region fallthrough
CT: control target
= control target key end

     0   :  { %s28_s0 = inlined_call_operand.vmem [shape: f32[8], index: 0, kind: input, shape index: {}]   ;;  %s29_s1 = inlined_call_operand.vmem [shape: f32[10,8], index: 1, kind: output, shape index: {}]  }
   0x1   :  { %v4_v0 = vld [vmem:[%s28_s0] ss:$0 sm:$0xff] }
   0x2   :  { %5 = vst [vmem:[%s29_s1] sm:$0xff] %v4_v0  ;;  %8 = vst [vmem:[%s29_s1 + $0x8] sm:$0xff] %v4_v0 }

// kernel: tcn_forward.1
= control target key start
LH: loop header
LB: loop body
LE: loop exit
PB: predicated region body
PF: predicated region fallthrough
CT: control target
= control target key end

     0   :  { %vm42_vm0 = vcmask 818176   ;;  %vm49_vm1 = vcmask 1043456   ;;  %vm147_vm2 = vcmask 654336   ;;  %vm233_vm3 = vcmask 523264   ;;  %s489_s1 = inlined_call_operand.vmem [shape: f32[100,80], index: 1, kind: input, shape index: {}]   ;;  %s490_s0 = inlined_call_operand.vmem [shape: f32[16,100], index: 0, kind: input, shape index: {}]   ;;  %s491_s3 = inlined_call_operand.vmem [shape: f32[80,64], index: 3, kind: input, shape index: {}]   ;;  %s492_s2 = inlined_call_operand.vmem [shape: f32[1,80], index: 2, kind: input, shape index: {}]   ;;  %s493_s4 = inlined_call_operand.vmem [shape: f32[1,64], index: 4, kind: input, shape index: {}]   ;;  %s494_s5 = inlined_call_operand.vmem [shape: f32[16,64], index: 5, kind: output, shape index: {}]  }
   0x1   :  { %v22_v0 = vld [vmem:[%s489_s1] sm:$0xff]  ;;  %v23_v1 = vld [vmem:[%s489_s1 + $0x8] sm:$0xff]  ;;  %v24_v2 = vld [vmem:[%s489_s1 + $0x10] sm:$0xff] }
   0x2   :  { %v326_v3 = vpack.c.bf16 %v23_v1, %v22_v0  ;;  %v25_v4 = vld [vmem:[%s489_s1 + $0x18] sm:$0xff]  ;;  %v26_v6 = vld [vmem:[%s489_s1 + $0x20] sm:$0xff]  ;;  %v27_v7 = vld [vmem:[%s489_s1 + $0x28] sm:$0xff] }
   0x3   :  { %v330_v5 = vpack.c.bf16 %v25_v4, %v24_v2  ;;  %v20_v8 = vld [vmem:[%s490_s0] sm:$0xff]  ;;  %v334_v9 = vpack.c.bf16 %v27_v7, %v26_v6  ;;  %v131_v11 = vld [vmem:[%s491_s3 + $0x8] sm:$0xff]  ;;  %v132_v12 = vld [vmem:[%s491_s3 + $0x10] sm:$0xff] }
   0x4   :  { %327 = vmatprep.subr.bf16.mxu0 %v326_v3  ;;  %300 = vmatprep.mubr.msk.f32.mxu0 %vm42_vm0, %v20_v8  ;;  %v130_v10 = vld [vmem:[%s491_s3] sm:$0xff]  ;;  %v28_v13 = vld [vmem:[%s489_s1 + $0x30] sm:$0xff]  ;;  %v29_v14 = vld [vmem:[%s489_s1 + $0x38] sm:$0xff] }
   0x5   :  { %329 = vmatpush3.bf16.msra.mxu0 %v326_v3  ;;  %v350_v15 = vpack.c.bf16 %v131_v11, %v130_v10  ;;  %v133_v16 = vld [vmem:[%s491_s3 + $0x18] sm:$0xff]  ;;  %v134_v18 = vld [vmem:[%s491_s3 + $0x20] sm:$0xff]  ;;  %v135_v19 = vld [vmem:[%s491_s3 + $0x28] sm:$0xff]  ;;  %v338_v20 = vpack.c.bf16 %v29_v14, %v28_v13 }
   0x6   :  { %331 = vmatprep.subr.bf16.mxu0 %v330_v5  ;;  %v354_v17 = vpack.c.bf16 %v133_v16, %v132_v12  ;;  %v30_v21 = vld [vmem:[%s489_s1 + $0x40] sm:$0xff]  ;;  %v31_v22 = vld [vmem:[%s489_s1 + $0x48] sm:$0xff]  ;;  %v358_v23 = vpack.c.bf16 %v135_v19, %v134_v18  ;;  %v136_v24 = vld [vmem:[%s491_s3 + $0x30] sm:$0xff] }
   0x7   :  { %351 = vmatprep.subr.bf16.mxu1 %v350_v15  ;;  %v137_v25 = vld [vmem:[%s491_s3 + $0x38] sm:$0xff]  ;;  %v342_v26 = vpack.c.bf16 %v31_v22, %v30_v21  ;;  %v32_v27 = vld [vmem:[%s489_s1 + $0x50] sm:$0xff]  ;;  %v34_v31 = vld [vmem:[%s489_s1 + $0x60] sm:$0xf] }
   0x8   :  { %353 = vmatpush3.bf16.msra.mxu1 %v350_v15  ;;  %v33_v28 = vld [vmem:[%s489_s1 + $0x58] sm:$0xff]  ;;  %v362_v29 = vpack.c.bf16 %v137_v25, %v136_v24  ;;  %v21_v32 = vld [vmem:[%s490_s0 + $0x8] sm:$0xff]  ;;  %v138_v33 = vld [vmem:[%s491_s3 + $0x40] sm:$0xff] }
   0x9   :  { %333 = vmatpush3.bf16.msra.mxu0 %v330_v5  ;;  %355 = vmatprep.subr.bf16.mxu1 %v354_v17  ;;  %v346_v30 = vpack.c.bf16 %v33_v28, %v32_v27  ;;  %v139_v34 = vld [vmem:[%s491_s3 + $0x48] sm:$0xff]  ;;  %v240_v36 = vld [vmem:[%s492_s2] ss:$0 sm:$0xff] }
   0xa   :  { %335 = vmatprep.subr.bf16.mxu0 %v334_v9  ;;  %v366_v35 = vpack.c.bf16 %v139_v34, %v138_v33  ;;  %v244_v43 = vld [vmem:[%s493_s4] ss:$0 sm:$0xff] }
   0xc   :  { %357 = vmatpush3.bf16.msra.mxu1 %v354_v17 }
   0xd   :  { %337 = vmatpush3.bf16.msra.mxu0 %v334_v9  ;;  %359 = vmatprep.subr.bf16.mxu1 %v358_v23 }
   0xe   :  { %339 = vmatprep.subr.bf16.mxu0 %v338_v20 }
  0x10   :  { %361 = vmatpush3.bf16.msra.mxu1 %v358_v23 }
  0x11   :  { %341 = vmatpush3.bf16.msra.mxu0 %v338_v20  ;;  %363 = vmatprep.subr.bf16.mxu1 %v362_v29 }
  0x12   :  { %343 = vmatprep.subr.bf16.mxu0 %v342_v26 }
  0x14   :  { %365 = vmatpush3.bf16.msra.mxu1 %v362_v29 }
  0x15   :  { %345 = vmatpush3.bf16.msra.mxu0 %v342_v26  ;;  %367 = vmatprep.subr.bf16.mxu1 %v366_v35 }
  0x16   :  { %347 = vmatprep.subr.bf16.mxu0 %v346_v30 }
  0x18   :  { %369 = vmatpush3.bf16.msra.mxu1 %v366_v35 }
  0x19   :  { %349 = vmatpush3.bf16.msra.mxu0 %v346_v30 }
  0x1a   :  { %298 = vmatprep.subr.msk.mxu0 %vm49_vm1, %v34_v31 }
  0x1d   :  { %299 = vmatpush3.msk.msra.mxu0 %vm49_vm1, %v34_v31 }
  0x1e   :  { %301 = vmatmul.mubr.msk.f32.vlgmr.msra.gmra.mrb[0].mxu0 %vm42_vm0, %v21_v32 }
  0xf1   :  { %v302_v37 = vpop.f32.mrb[0].mxu0 }
  0xf2   :  { %v125_v38 = vadd.f32 %v302_v37, %v240_v36  ;;  %v119_v39 = vpop.f32.mrb[1].mxu0 }
  0xf3   :  { %v120_v40 = vadd.f32 %v240_v36, %v119_v39 }
  0xf4   :  { %v129_v42 = vmax.f32 %v125_v38, 0.0 }
  0xf5   :  { %v128_v41 = vmax.f32 %v120_v40, 0.0 }
  0xf7   :  { %323 = vmatprep.mubr.msk.f32.mxu1 %vm147_vm2, %v128_v41 }
  0xf8   :  { %324 = vmatmul.mubr.msk.f32.vlgmr.msra.gmra.mrb[0].mxu1 %vm147_vm2, %v129_v42 }
 0x1cb   :  { %v325_v44 = vpop.f32.mrb[0].mxu1 }
 0x1cc   :  { %v226_v45 = vadd.f32 %v325_v44, %v244_v43  ;;  %v220_v46 = vpop.f32.mrb[1].mxu1 }
 0x1cd   :  { %v221_v47 = vadd.f32 %v244_v43, %v220_v46 }
 0x1ce   :  { %v230_v48 = vmax.f32 %v226_v45, 0.0 }
 0x1cf   :  { %v229_v49 = vmax.f32 %v221_v47, 0.0 }
 0x1d0   :  { %v232_v50 = vsub.f32 0.0, %v230_v48 }
 0x1d1   :  { %v231_v51 = vsub.f32 0.0, %v229_v49 }
 0x1d2   :  { %235 = vst.msk [vmem:[%s494_s5 + $0x8] sm:$0xff] %vm233_vm3, %v232_v50 }
 0x1d3   :  { %234 = vst.msk [vmem:[%s494_s5] sm:$0xff] %vm233_vm3, %v231_v51 }

</bundles_post_ra>
